<compile_context>
chip_gen: v5e
topology: v5e:2x2
jax: 0.10.0
libtpu: 0.0.40
codegen_flags: <defaults>
</compile_context>

<pallas_src>
from functools import partial

import numpy as np
import jax
import jax.numpy as jnp
from jax.experimental import pallas as pl
from jax.experimental.pallas import tpu as pltpu

K_BITS = 4
M = 2 ** K_BITS      # 16 input features
HIDDEN = 32
N_OUT = 7
N_PAD = 8            # output rows padded to a full sublane tile (row 7 is exactly 0)
EPS = 1e-12          # F.normalize default eps (clamp on the un-squared norm)
SQRT_N = float(np.sqrt(N_OUT))

TB_MAX = 8192        # batch-tile (lane) width; per-step HBM ~0.75 MiB, VMEM ~4-5 MiB


def _cdiv(a, b):
    return -(-a // b)


def _round_up(x, m):
    return ((x + m - 1) // m) * m


def transmitter_kernel(x_ref, w1_ref, b1_ref, w2_ref, b2_ref, o_ref):
    # x_ref: (TB, M) natural layout (batch on sublanes).  The transpose into the
    # batch-on-lanes compute layout is folded into the MXU contraction below
    # (contract W1^T's last dim with x's last dim -> h^T of shape (H, TB)).
    x = x_ref[...]                                                     # (TB, M) f32
    h = jax.lax.dot_general(
        w1_ref[...], x,
        dimension_numbers=(((1,), (1,)), ((), ())),
        preferred_element_type=jnp.float32)                            # (H, TB) MXU
    h = jnp.maximum(h + b1_ref[...], 0.0)                              # bias + ReLU (VPU)
    y = jnp.dot(w2_ref[...], h, preferred_element_type=jnp.float32)    # (N_PAD, TB) MXU
    y = y + b2_ref[...]                                                # pad row stays 0
    # F.normalize(y, p=2, dim=features) * sqrt(n):
    #   denom = max(||y||_2, eps)  <=>  rsqrt(max(sum(y^2), eps^2))
    ssq = jnp.sum(y * y, axis=0, keepdims=True)                        # (1, TB) sublane reduce (XLU)
    inv = jax.lax.rsqrt(jnp.maximum(ssq, EPS * EPS)) * SQRT_N          # EUP rsqrt, sqrt(n) folded in
    o_ref[...] = (y * inv).astype(o_ref.dtype)                         # lane-dense, full-sublane store


@partial(jax.jit, static_argnames=("transposed_output",))
def transmitter_forward(x, w1, b1, w2, b2, *, transposed_output=False):
    """x: (B, M) f32. w1: (M, H), b1: (1, H), w2: (H, N), b2: (1, N).

    Returns (B, N) f32 (or (N, B) if transposed_output=True, saving the final
    transpose for consumers that can accept the transposed layout)."""
    B = x.shape[0]

    # Tile selection: aim for >= 2 blocks (v7x has 2 TensorCores) while capping the
    # tile at TB_MAX.  128-multiples keep blocks (8,128)-legal; when a single block
    # would cover the whole batch, use the exact batch size (no padding at all).
    TB = min(TB_MAX, _round_up(max(_cdiv(B, 2), 1), 128))
    if TB >= B:
        TB = B
    grid = (_cdiv(B, TB),)

    # One-time tiny layout plumbing on the weights (7x32-ish, negligible):
    w1T = w1.T                                                         # (H, M)
    b1c = jnp.reshape(b1, (HIDDEN, 1))                                 # (H, 1)
    w2T = jnp.pad(w2.T, ((0, N_PAD - N_OUT), (0, 0)))                  # (N_PAD, H), pad row = 0
    b2c = jnp.pad(jnp.reshape(b2, (N_OUT, 1)), ((0, N_PAD - N_OUT), (0, 0)))  # (N_PAD, 1)

    outT = pl.pallas_call(
        transmitter_kernel,
        out_shape=jax.ShapeDtypeStruct((N_PAD, B), jnp.float32),
        grid=grid,
        in_specs=[
            pl.BlockSpec((TB, M), lambda i: (i, 0)),           # x: natural layout, tiled over batch
            pl.BlockSpec((HIDDEN, M), lambda i: (0, 0)),       # W1^T: resident across grid steps
            pl.BlockSpec((HIDDEN, 1), lambda i: (0, 0)),       # b1:   resident
            pl.BlockSpec((N_PAD, HIDDEN), lambda i: (0, 0)),   # W2^T (padded): resident
            pl.BlockSpec((N_PAD, 1), lambda i: (0, 0)),        # b2   (padded): resident
        ],
        out_specs=pl.BlockSpec((N_PAD, TB), lambda i: (0, i)),  # lane-dense transposed output
        compiler_params=pltpu.CompilerParams(
            # Batch axis is embarrassingly parallel; lets v7x shard it over its 2 TCs.
            # (pltpu.CORE_PARALLEL is an alternative if plain "parallel" does not shard.)
            dimension_semantics=("parallel",),
        ),
    )(x, w1T, b1c, w2T, b2c)

    if transposed_output:
        return outT[:N_OUT, :]                                 # (N_OUT, B)
    return outT[:N_OUT, :].T                                   # (B, N_OUT), matches the module


def init_params(key):
    # Deterministic init mimicking nn.Linear defaults (uniform(-1/sqrt(fan_in), +)).
    k1, k2, k3, k4 = jax.random.split(key, 4)
    bound1 = 1.0 / np.sqrt(M)
    bound2 = 1.0 / np.sqrt(HIDDEN)
    w1 = jax.random.uniform(k1, (M, HIDDEN), jnp.float32, -bound1, bound1)
    b1 = jax.random.uniform(k2, (1, HIDDEN), jnp.float32, -bound1, bound1)
    w2 = jax.random.uniform(k3, (HIDDEN, N_OUT), jnp.float32, -bound2, bound2)
    b2 = jax.random.uniform(k4, (1, N_OUT), jnp.float32, -bound2, bound2)
    return w1, b1, w2, b2


def reference_forward(x, w1, b1, w2, b2):
    # Pure-JAX reference of the PyTorch forward.
    h = jnp.maximum(x @ w1 + b1, 0.0)
    y = h @ w2 + b2
    norm = jnp.maximum(jnp.linalg.norm(y, axis=1, keepdims=True), EPS)
    return y / norm * SQRT_N


if __name__ == "__main__":
    key = jax.random.PRNGKey(0)
    kx, kx2, kp = jax.random.split(key, 3)
    w1, b1, w2, b2 = init_params(kp)

    # Small batch consistent with the module (message vectors of length M=16).
    B = 8
    x = jax.random.normal(kx, (B, M), jnp.float32)
    out = jax.block_until_ready(transmitter_forward(x, w1, b1, w2, b2))
    ref = reference_forward(x, w1, b1, w2, b2)
    np.testing.assert_allclose(np.asarray(out), np.asarray(ref), rtol=1e-5, atol=1e-5)

    # Larger, non-multiple batch: exercises the multi-block grid + ragged tail block.
    B2 = 2500
    x2 = jax.random.normal(kx2, (B2, M), jnp.float32)
    out2 = jax.block_until_ready(transmitter_forward(x2, w1, b1, w2, b2))
    ref2 = reference_forward(x2, w1, b1, w2, b2)
    np.testing.assert_allclose(np.asarray(out2), np.asarray(ref2), rtol=1e-5, atol=1e-5)

    print("KERNEL_OK")
</pallas_src>

<mosaic_0001>
module attributes {stable_mosaic.version = 11 : i64} {
  func.func @transmitter_kernel(%arg0: i32, %arg1: memref<8x16xf32, #tpu.memory_space<vmem>>, %arg2: memref<32x16xf32, #tpu.memory_space<vmem>>, %arg3: memref<32x1xf32, #tpu.memory_space<vmem>>, %arg4: memref<8x32xf32, #tpu.memory_space<vmem>>, %arg5: memref<8x1xf32, #tpu.memory_space<vmem>>, %arg6: memref<8x8xf32, #tpu.memory_space<vmem>>) attributes {dimension_semantics = [#tpu.dimension_semantics<parallel>], iteration_bounds = array<i64: 1>, scalar_prefetch = 0 : i64, scratch_operands = 0 : i64, tpu.core_type = #tpu.core_type<tc>, window_params = [{transform_indices = @transform_0, window_bounds = array<i64: 8, 16>}, {pipeline_mode = #tpu.pipeline_mode<synchronous>, transform_indices = @transform_1, window_bounds = array<i64: 32, 16>}, {pipeline_mode = #tpu.pipeline_mode<synchronous>, transform_indices = @transform_2, window_bounds = array<i64: 32, 1>}, {pipeline_mode = #tpu.pipeline_mode<synchronous>, transform_indices = @transform_3, window_bounds = array<i64: 8, 32>}, {pipeline_mode = #tpu.pipeline_mode<synchronous>, transform_indices = @transform_4, window_bounds = array<i64: 8, 1>}, {transform_indices = @transform_5, window_bounds = array<i64: 8, 8>}]} {
    %c0 = arith.constant 0 : index
    %c0_0 = arith.constant 0 : index
    %0 = vector.load %arg1[%c0, %c0_0] : memref<8x16xf32, #tpu.memory_space<vmem>>, vector<8x16xf32>
    %c0_1 = arith.constant 0 : index
    %c0_2 = arith.constant 0 : index
    %1 = vector.load %arg2[%c0_1, %c0_2] : memref<32x16xf32, #tpu.memory_space<vmem>>, vector<32x16xf32>
    %cst = arith.constant dense<0.000000e+00> : vector<32x8xf32>
    %2 = tpu.matmul %1, %0, %cst {dimension_numbers = #tpu.dot_dimension_numbers<[1], [1], [0], [0], [0, 0, 1, 0], [], []>} : vector<32x16xf32>, vector<8x16xf32>, vector<32x8xf32> -> vector<32x8xf32>
    %c0_3 = arith.constant 0 : index
    %c0_4 = arith.constant 0 : index
    %3 = vector.load %arg3[%c0_3, %c0_4] : memref<32x1xf32, #tpu.memory_space<vmem>>, vector<32x1xf32>
    %4 = vector.broadcast %3 : vector<32x1xf32> to vector<32x8xf32>
    %5 = arith.addf %2, %4 : vector<32x8xf32>
    %cst_5 = arith.constant 0.000000e+00 : f32
    %6 = vector.broadcast %cst_5 : f32 to vector<32x8xf32>
    %7 = arith.maximumf %5, %6 : vector<32x8xf32>
    %c0_6 = arith.constant 0 : index
    %c0_7 = arith.constant 0 : index
    %8 = vector.load %arg4[%c0_6, %c0_7] : memref<8x32xf32, #tpu.memory_space<vmem>>, vector<8x32xf32>
    %cst_8 = arith.constant dense<0.000000e+00> : vector<8x8xf32>
    %9 = tpu.matmul %8, %7, %cst_8 {dimension_numbers = #tpu.dot_dimension_numbers<[1], [0], [0], [1], [0, 0, 1, 1], [], []>} : vector<8x32xf32>, vector<32x8xf32>, vector<8x8xf32> -> vector<8x8xf32>
    %c0_9 = arith.constant 0 : index
    %c0_10 = arith.constant 0 : index
    %10 = vector.load %arg5[%c0_9, %c0_10] : memref<8x1xf32, #tpu.memory_space<vmem>>, vector<8x1xf32>
    %11 = vector.broadcast %10 : vector<8x1xf32> to vector<8x8xf32>
    %12 = arith.addf %9, %11 : vector<8x8xf32>
    %13 = arith.mulf %12, %12 : vector<8x8xf32>
    %cst_11 = arith.constant dense<0.000000e+00> : vector<8xf32>
    %14 = vector.multi_reduction <add>, %13, %cst_11 [0] : vector<8x8xf32> to vector<8xf32>
    %15 = vector.shape_cast %14 : vector<8xf32> to vector<1x8xf32>
    %cst_12 = arith.constant 1.000000e-24 : f32
    %16 = vector.broadcast %cst_12 : f32 to vector<1x8xf32>
    %17 = arith.maximumf %15, %16 : vector<1x8xf32>
    %18 = math.rsqrt %17 : vector<1x8xf32>
    %cst_13 = arith.constant 2.64575124 : f32
    %19 = vector.broadcast %cst_13 : f32 to vector<1x8xf32>
    %20 = arith.mulf %18, %19 : vector<1x8xf32>
    %21 = vector.broadcast %20 : vector<1x8xf32> to vector<8x8xf32>
    %22 = arith.mulf %12, %21 : vector<8x8xf32>
    %c0_14 = arith.constant 0 : index
    %c0_15 = arith.constant 0 : index
    %23 = vector.load %arg6[%c0_14, %c0_15] : memref<8x8xf32, #tpu.memory_space<vmem>>, vector<8x8xf32>
    tpu.vector_store %arg6[%c0_14, %c0_15], %22 {strides = array<i32>} : memref<8x8xf32, #tpu.memory_space<vmem>>, vector<8x8xf32>,
    return
  }
  func.func @transform_0(%arg0: i32) -> (i32, i32) {
    %c0_i32 = arith.constant 0 : i32
    %c0_i32_0 = arith.constant 0 : i32
    return %arg0, %c0_i32 : i32, i32
  }
  func.func @transform_1(%arg0: i32) -> (i32, i32) {
    %c0_i32 = arith.constant 0 : i32
    %c0_i32_0 = arith.constant 0 : i32
    %c0_i32_1 = arith.constant 0 : i32
    return %c0_i32, %c0_i32_0 : i32, i32
  }
  func.func @transform_2(%arg0: i32) -> (i32, i32) {
    %c0_i32 = arith.constant 0 : i32
    %c0_i32_0 = arith.constant 0 : i32
    %c0_i32_1 = arith.constant 0 : i32
    return %c0_i32, %c0_i32_0 : i32, i32
  }
  func.func @transform_3(%arg0: i32) -> (i32, i32) {
    %c0_i32 = arith.constant 0 : i32
    %c0_i32_0 = arith.constant 0 : i32
    %c0_i32_1 = arith.constant 0 : i32
    return %c0_i32, %c0_i32_0 : i32, i32
  }
  func.func @transform_4(%arg0: i32) -> (i32, i32) {
    %c0_i32 = arith.constant 0 : i32
    %c0_i32_0 = arith.constant 0 : i32
    %c0_i32_1 = arith.constant 0 : i32
    return %c0_i32, %c0_i32_0 : i32, i32
  }
  func.func @transform_5(%arg0: i32) -> (i32, i32) {
    %c0_i32 = arith.constant 0 : i32
    %c0_i32_0 = arith.constant 0 : i32
    return %c0_i32, %arg0 : i32, i32
  }
}

</mosaic_0001>

<bundles_post_ra>
// kernel: transmitter_forward.1
= control target key start
LH: loop header
LB: loop body
LE: loop exit
PB: predicated region body
PF: predicated region fallthrough
CT: control target
= control target key end

     0   :  { %vm49_vm0 = vcmask 130048   ;;  %v170_v1 = vmov 0   ;;  %vm105_vm1 = vcmask 261120   ;;  %vm130_vm2 = vcmask 64512   ;;  %s246_s0 = inlined_call_operand.vmem [shape: f32[8,16], index: 0, kind: input, shape index: {}]   ;;  %s247_s1 = inlined_call_operand.vmem [shape: f32[32,16], index: 1, kind: input, shape index: {}]   ;;  %s248_s2 = inlined_call_operand.vmem [shape: f32[32,1], index: 2, kind: input, shape index: {}]   ;;  %s249_s4 = inlined_call_operand.vmem [shape: f32[8,1], index: 4, kind: input, shape index: {}]   ;;  %s250_s3 = inlined_call_operand.vmem [shape: f32[8,32], index: 3, kind: input, shape index: {}]   ;;  %s251_s5 = inlined_call_operand.vmem [shape: f32[8,8], index: 5, kind: output, shape index: {}]  }
   0x1   :  { %v20_v0 = vld [vmem:[%s246_s0] sm:$0xff]  ;;  %165 = vset.pattern.permute.xlu0 %v170_v1  ;;  %166 = vset.pattern.permute.xlu1 %v170_v1  ;;  %v22_v2 = vld [vmem:[%s247_s1 + $0x8] sm:$0xff]  ;;  %v24_v3 = vld [vmem:[%s247_s1 + $0x18] sm:$0xff] }
   0x2   :  { %162 = vmatpush.xpose.msk.msra.mxu2 %vm49_vm0, %v20_v0  ;;  %163 = vmatpush.xpose.msk.msra.mxu3 %vm49_vm0, %v20_v0  ;;  %v28_v4 = vld [vmem:[%s248_s2 + $0x18] sm:$0xff]  ;;  %v21_v5 = vld [vmem:[%s247_s1] sm:$0xff]  ;;  %v26_v6 = vld [vmem:[%s248_s2 + $0x8] sm:$0xff] }
   0x3   :  { %156 = vmatpush.xpose.msk.msra.mxu0 %vm49_vm0, %v20_v0  ;;  %46 = vperm.xlu0 %165, %v28_v4   ;;  %v27_v7 = vld [vmem:[%s248_s2 + $0x10] sm:$0xff]  ;;  %v25_v8 = vld [vmem:[%s248_s2] sm:$0xff] }
   0x4   :  { %36 = vperm.xlu1 %166, %v26_v6   ;;  %167 = vset.pattern.permute.xlu2 %v170_v1  ;;  %v23_v9 = vld [vmem:[%s247_s1 + $0x10] sm:$0xff]  ;;  %v99_v10 = vld [vmem:[%s249_s4] sm:$0xff] }
   0x5   :  { %158 = vmatmul.msk.f32.vlgmr.msra.gmra.mxu2 %vm49_vm0, %v22_v2  ;;  %160 = vmatmul.msk.f32.vlgmr.msra.gmra.mxu3 %vm49_vm0, %v24_v3  ;;  %v98_v27 = vld [vmem:[%s250_s3] sm:$0xff] }
   0x6   :  { %157 = vmatmul.msk.f32.vlgmr.msra.gmra.mxu0 %vm49_vm0, %v21_v5  ;;  %102 = vperm.xlu2 %167, %v99_v10  }
   0xb   :  { %41 = vperm.xlu0 %165, %v27_v7  }
   0xc   :  { %31 = vperm.xlu1 %166, %v25_v8  }
   0xd   :  { %159 = vmatmul.msk.f32.gmra.mxu2 %vm49_vm0, %v23_v9 }
  0x60   :  { %v103_v28 = vpop.permute.xlu2 %102 }
  0x75   :  { %v47_v11 = vpop.permute.xlu0 %46 }
  0x76   :  { %v37_v12 = vpop.permute.xlu1 %36 }
  0x7d   :  { %v42_v17 = vpop.permute.xlu0 %41 }
  0x7e   :  { %v32_v18 = vpop.permute.xlu1 %31 }
  0x83   :  { %v82_v19 = vpop.f32.mrf.mxu0 }
  0x84   :  { %v83_v23 = vadd.f32 %v82_v19, %v32_v18 }
  0x86   :  { %v94_v26 = vmax.f32 %v83_v23, 0.0 }
  0x88   :  { %v85_v13 = vpop.f32.mrf.mxu2  ;;  %v91_v14 = vpop.f32.mrf.mxu3 }
  0x89   :  { %v92_v15 = vadd.f32 %v91_v14, %v47_v11  ;;  %v86_v21 = vadd.f32 %v85_v13, %v37_v12 }
  0x8b   :  { %v97_v16 = vmax.f32 %v92_v15, 0.0  ;;  %v95_v25 = vmax.f32 %v86_v21, 0.0 }
  0x8d   :  { %121 = vmatpush.msra.mxu1 %v97_v16 }
  0x90   :  { %v88_v20 = vpop.f32.mrf.mxu2 }
  0x91   :  { %v89_v22 = vadd.f32 %v88_v20, %v42_v17 }
  0x93   :  { %v96_v24 = vmax.f32 %v89_v22, 0.0 }
  0x95   :  { %122 = vmatpush.msra.mxu1 %v96_v24 }
  0x97   :  { %123 = vmatpush.msra.mxu1 %v95_v25 }
  0x99   :  { %124 = vmatpush.msra.mxu1 %v94_v26 }
  0x9a   :  { %161 = vmatmul.msk.f32.vlgmr.msra.gmra.mxu1 %vm105_vm1, %v98_v27 }
 0x117   :  { %v126_v29 = vpop.f32.mrf.mxu1 }
 0x118   :  { %v127_v30 = vadd.f32 %v126_v29, %v103_v28 }
 0x11a   :  { %v129_v31 = vmul.f32 %v127_v30, %v127_v30 }
 0x11c   :  { %v131_v32 = vsel %vm130_vm2, %v129_v31, 0.0 }
 0x11d   :  { %v132_v33 = vrot.slane %v131_v32, 4 }
 0x11f   :  { %v133_v34 = vadd.f32 %v132_v33, %v131_v32 }
 0x121   :  { %v134_v35 = vrot.slane %v133_v34, 2 }
 0x123   :  { %v135_v36 = vadd.f32 %v134_v35, %v133_v34 }
 0x125   :  { %v136_v37 = vrot.slane %v135_v36, 1 }
 0x127   :  { %v137_v38 = vadd.f32 %v136_v37, %v135_v36 }
 0x129   :  { %v138_v39 = vmax.f32 %v137_v38, 1e-24 }
 0x12b   :  { %168 = vrsqrt.f32 %v138_v39  ;;  %vm145_vm4 = vweird.f32 %v138_v39 }
 0x131   :  { %v169_v40 = vpop.eup %168 }
 0x132   :  { %v140_v41 = vmul.f32 %v169_v40, %v138_v39  ;;  %vm146_vm3 = vweird.f32 %v169_v40 }
 0x133   :  { %vm147_vm5 = vmor %vm145_vm4, %vm146_vm3 }
 0x134   :  { %v141_v42 = vmul.f32 %v169_v40, %v140_v41 }
 0x136   :  { %v142_v43 = vmul.f32 0.5, %v141_v42 }
 0x138   :  { %v143_v44 = vsub.f32 1.5, %v142_v43 }
 0x13a   :  { %v144_v45 = vmul.f32 %v169_v40, %v143_v44 }
 0x13c   :  { %v148_v46 = vsel %vm147_vm5, %v169_v40, %v144_v45 }
 0x13d   :  { %v149_v47 = vmul.f32 2.6457512, %v148_v46 }
 0x13f   :  { %v150_v48 = vmul.f32 %v149_v47, %v127_v30 }
 0x141   :  { %151 = vst.msk [vmem:[%s251_s5] sm:$0xff] %vm130_vm2, %v150_v48 }

</bundles_post_ra>
